<compile_context>
chip_gen: v5e
topology: v5e:2x2
jax: 0.10.0
libtpu: 0.0.40
codegen_flags: <defaults>
</compile_context>

<pallas_src>
import jax
import jax.numpy as jnp
from jax.experimental import pallas as pl
from jax.experimental.pallas import tpu as pltpu

EPS = 1e-08
_SENTINEL = -30.0          # sigmoid(-30) == 0 exactly in the tanh form used in-kernel


# ----------------------------------------------------------------------------- helpers


def _round_up(n, m):
    return ((n + m - 1) // m) * m


def _unpack_params(params_ref):
    p = params_ref[...]                                       # (tile_bc, 8) f32
    y, t, two_inv_t, inv_t2, alpha, c2 = (p[:, k:k + 1] for k in range(6))
    return y, t, two_inv_t, inv_t2, alpha, c2


def _sigmoid(x):
    # Single EUP push per element (vs exp + reciprocal); saturates exactly to {0, 1}.
    return 0.5 * jnp.tanh(0.5 * x) + 0.5


def _piecewise(xs, two_inv_t, inv_t2, alpha, c2):
    # h_low  = -(xs^2/t^2) + 2*xs/t         == xs * (2/t - xs/t^2)
    # h_high = alpha*(1 - xs)*(1 - 2t + xs) == alpha*(1 - xs)*(c2 + xs)
    low = xs * (two_inv_t - xs * inv_t2)
    high = alpha * (1.0 - xs) * (c2 + xs)
    return low, high


def _lane_accumulate(out_ref, v):
    """Add a (tile_bc, tile_hw) tile into a lane-dense (tile_bc, 128) accumulator.

    Pure VPU adds over 128-lane chunks (vreg selects, no cross-lane XLU work);
    the final 128 -> 1 reduction happens once in the wrapper."""
    acc = out_ref[...]
    n = v.shape[1]
    for s in range(0, n, 128):
        acc = acc + v[:, s:s + 128]
    out_ref[...] = acc


# ----------------------------------------------------------------------------- kernels


def _make_kernel_a(hw_true, need_col_mask):
    """Per-row lane-dense partial sums of h_low + h_high + neg_loss (iter % 100 < 80)."""

    def kernel(params_ref, x_ref, out_ref):
        @pl.when(pl.program_id(1) == 0)
        def _():
            out_ref[...] = jnp.zeros_like(out_ref)

        y, t, two_inv_t, inv_t2, alpha, c2 = _unpack_params(params_ref)
        x = x_ref[...].astype(jnp.float32)                    # native dtype stream, cast in VMEM
        xs = _sigmoid(x)
        low, high = _piecewise(xs, two_inv_t, inv_t2, alpha, c2)
        pos = y * jnp.where(xs <= t, low, high)               # mask_low/mask_high complementary
        # Matches torch.log((1 - sigmoid).clamp(min=eps)) exactly (keeps PyTorch clamp
        # semantics; saturates for very large logits rather than switching to softplus).
        neg = (y - 1.0) * jnp.log(jnp.maximum(1.0 - xs, EPS))
        v = pos + neg
        if need_col_mask:                                     # H*W padded to a lane multiple
            tb, th = v.shape
            col = jax.lax.broadcasted_iota(jnp.int32, (tb, th), 1) + pl.program_id(1) * th
            v = jnp.where(col < hw_true, v, 0.0)
        _lane_accumulate(out_ref, v)

    return kernel


def _make_kernel_b(hw_true, need_col_mask):
    """Per-row lane-dense partial sums of h_low, h_high, mask_low (iter % 100 >= 80)."""

    def kernel(params_ref, x_ref, hlow_ref, hhigh_ref, mlow_ref):
        @pl.when(pl.program_id(1) == 0)
        def _():
            hlow_ref[...] = jnp.zeros_like(hlow_ref)
            hhigh_ref[...] = jnp.zeros_like(hhigh_ref)
            mlow_ref[...] = jnp.zeros_like(mlow_ref)

        y, t, two_inv_t, inv_t2, alpha, c2 = _unpack_params(params_ref)
        x = x_ref[...].astype(jnp.float32)
        xs = _sigmoid(x)
        if need_col_mask:                                     # padded cols must not count in mask_low
            tb, th = xs.shape
            col = jax.lax.broadcasted_iota(jnp.int32, (tb, th), 1) + pl.program_id(1) * th
            y = jnp.where(col < hw_true, y, 0.0)              # (tile_bc, tile_hw) masked weight
        low, high = _piecewise(xs, two_inv_t, inv_t2, alpha, c2)
        cond = xs <= t
        zero = jnp.zeros_like(xs)
        _lane_accumulate(hlow_ref, y * jnp.where(cond, low, zero))
        _lane_accumulate(hhigh_ref, y * jnp.where(cond, zero, high))
        _lane_accumulate(mlow_ref, y * jnp.where(cond, 1.0, 0.0))

    return kernel


# ------------------------------------------------------------------------- tiling / call


def _vmem_budget():
    """Generation-aware VMEM limit and per-step block budget."""
    cap = None
    try:
        info = pltpu.get_tpu_info()
        cap = int(getattr(info, "vmem_capacity_bytes", 0)) or None
    except Exception:
        cap = None
    if cap is None:
        cap = 64 * 1024 * 1024                      # conservative default (v7x per-TC VMEM)
    if cap >= 128 * 1024 * 1024:                    # v5e / v6e: 128 MiB physical
        limit = 96 * 1024 * 1024
    else:                                           # v7x: 64 MiB physical per TC
        limit = min(cap - 16 * 1024 * 1024, 48 * 1024 * 1024)
    limit = max(limit, 32 * 1024 * 1024)
    budget = (limit * 3) // 4                       # headroom for compiler internal scratch
    return limit, budget


def _pick_tiling(bc, hw, x_itemsize, n_out, budget):
    """Choose (tile_bc, tile_hw, bc_pad, hw_pad) so all double-buffered blocks fit `budget`.
    tile_hw is a multiple of 128 (full H*W when possible); tile_bc a multiple of 8 that
    divides bc_pad; >= 2 bc blocks whenever bc allows (pipelining / megacore / v7x TCs)."""
    hw128 = _round_up(hw, 128)
    per_row_fixed = 2 * (1 + n_out) * 128 * 4      # params + lane-dense outputs, double-buffered

    def rows_for(cols):
        return budget // (2 * cols * x_itemsize + per_row_fixed)

    if rows_for(hw128) >= 8:
        tile_hw = hw128                             # full-width tile: params unpack amortized
    else:
        max_cols = (budget // 8 - per_row_fixed) // (2 * x_itemsize)
        tile_hw = min(hw128, max(128, (max_cols // 128) * 128))
    hw_pad = _round_up(hw, tile_hw)

    bc8 = _round_up(bc, 8)
    tile_bc = min(max((rows_for(tile_hw) // 8) * 8, 8), bc8)
    if tile_bc >= bc8 and bc8 >= 16:
        tile_bc = _round_up((bc8 + 1) // 2, 8)      # guarantee >= 2 blocks on the bc axis
    bc_pad = _round_up(bc8, tile_bc)
    return tile_bc, tile_hw, bc_pad, hw_pad


def _row_partial_call(kernel, n_outputs, x2d_pad, params_pad, tile_bc, tile_hw, vmem_limit):
    bc_pad, hw_pad = x2d_pad.shape
    grid = (bc_pad // tile_bc, hw_pad // tile_hw)
    out_sds = jax.ShapeDtypeStruct((bc_pad, 128), jnp.float32)
    out_spec = pl.BlockSpec((tile_bc, 128), lambda i, j: (i, 0))   # resident over the hw axis
    return pl.pallas_call(
        kernel,
        grid=grid,
        in_specs=[
            # Packed per-row constants: block index constant over the H*W axis, so it is
            # DMA'd only when the row tile changes (no narrow per-step DMAs).
            pl.BlockSpec((tile_bc, 8), lambda i, j: (i, 0)),
            # The big streamed x tile (native dtype).
            pl.BlockSpec((tile_bc, tile_hw), lambda i, j: (i, j)),
        ],
        out_specs=[out_spec] * n_outputs,
        out_shape=[out_sds] * n_outputs,
        compiler_params=pltpu.CompilerParams(
            dimension_semantics=("parallel", "arbitrary"),
            vmem_limit_bytes=vmem_limit),
    )(params_pad, x2d_pad)


# --------------------------------------------------------------------------------- API


def spatial_bce_loss(x, y, threshold_p=None, fg=None, iter=0):
    """Matches Spatial_BCE_Loss.forward for NCHW input x of shape (b, c, h, w)."""
    b, c, h, w = x.shape
    hw = h * w
    bc = b * c
    x2d = x.reshape(bc, hw)                               # keep native dtype (no f32 HBM copy)
    y2d = y.reshape(bc, 1).astype(jnp.float32)

    branch_a = (iter % 100) < 80
    n_out = 1 if branch_a else 3

    if branch_a:
        # Per-(b,c) threshold = index-th largest sigmoid value, index = int(fg * h*w).
        # sigmoid is monotone, so we take the index-th largest logit and sigmoid it.
        # TODO(synk): the k-th order statistic (torch.sort / top-k) is computed in plain
        # JAX glue (lax.top_k); there is no clean Pallas TPU sort primitive.
        idx = (fg.reshape(-1).astype(jnp.float32) * hw).astype(jnp.int32)   # trunc == .int()
        idx = jnp.clip(idx, 0, hw - 1)        # PyTorch would raise on idx == hw; we clamp
        try:                                  # static k for lax.top_k when fg is concrete
            kmax = int(jnp.max(idx)) + 1
        except Exception:                     # traced fg (under jit): fall back to full top-k
            kmax = hw
        kmax = int(min(max(kmax, 1), hw))
        top_vals = jax.lax.top_k(x2d, kmax)[0]                              # descending logits
        kth = jnp.take_along_axis(top_vals, jnp.minimum(idx, kmax - 1)[:, None], axis=1)
        t_col = _sigmoid(kth.astype(jnp.float32))        # same sigmoid form as the kernel
    else:
        tp = threshold_p.reshape(bc, hw).astype(jnp.float32)
        t_col = jax.nn.sigmoid(jnp.mean(tp, axis=1, keepdims=True))         # (bc, 1)

    # Per-row constants hoisted out of the kernel: threshold.clamp(min=0.0001), 2/t,
    # 1/t^2, alpha = 1/clamp((1-t)^2, eps), 1-2t, packed into a single (bc, 8) block.
    t = jnp.maximum(t_col, 1e-4)
    inv_t = 1.0 / t
    alpha = 1.0 / jnp.maximum((1.0 - t) * (1.0 - t), EPS)
    pad0 = jnp.zeros_like(t)
    params = jnp.concatenate(
        [y2d, t, 2.0 * inv_t, inv_t * inv_t, alpha, 1.0 - 2.0 * t, pad0, pad0], axis=1)

    vmem_limit, budget = _vmem_budget()
    x_itemsize = jnp.dtype(x.dtype).itemsize
    tile_bc, tile_hw, bc_pad, hw_pad = _pick_tiling(bc, hw, x_itemsize, n_out, budget)

    need_col_mask = hw_pad != hw
    if (bc_pad != bc) or (hw_pad != hw):
        # Padded rows: params are all-zero (y=0) and the sentinel logit gives sigmoid == 0,
        # so they contribute exactly 0 to every accumulated sum; padded columns are masked
        # in-kernel (required for branch B's mask_low count).
        x2d = jnp.pad(x2d, ((0, bc_pad - bc), (0, hw_pad - hw)), constant_values=_SENTINEL)
    if bc_pad != bc:
        params = jnp.pad(params, ((0, bc_pad - bc), (0, 0)))

    if branch_a:
        kern = _make_kernel_a(hw, need_col_mask)
        (rows,) = _row_partial_call(kern, 1, x2d, params, tile_bc, tile_hw, vmem_limit)
        return jnp.sum(rows) / (bc * hw)                                    # torch.mean
    kern = _make_kernel_b(hw, need_col_mask)
    hlow_rows, hhigh_rows, mlow_rows = _row_partial_call(
        kern, 3, x2d, params, tile_bc, tile_hw, vmem_limit)
    hlow, hhigh, mlow = jnp.sum(hlow_rows), jnp.sum(hhigh_rows), jnp.sum(mlow_rows)
    mhigh = jnp.sum(y2d) * hw - mlow          # mask_low + mask_high == y broadcast over H*W
    # Mirrors PyTorch: the divides are unguarded (inf/nan if a mask sum is zero).
    return hlow / mlow + hhigh / mhigh


# --------------------------------------------------------------------- reference & demo


def _reference(x, y, threshold_p=None, fg=None, iter=0):
    """Pure-JAX mirror of the PyTorch module (correctness check only)."""
    b, c, h, w = x.shape
    hw = h * w
    xs = jax.nn.sigmoid(x.reshape(b * c, hw).astype(jnp.float32))
    y_ = y.reshape(b * c, 1).astype(jnp.float32)
    if iter % 100 < 80:
        srt = -jnp.sort(-xs, axis=1)
        idx = jnp.clip((fg.reshape(-1).astype(jnp.float32) * hw).astype(jnp.int32), 0, hw - 1)
        t = jnp.take_along_axis(srt, idx[:, None], axis=1)
    else:
        tp = threshold_p.reshape(b * c, hw).astype(jnp.float32)
        t = jax.nn.sigmoid(jnp.mean(tp, axis=1, keepdims=True))
    t = jnp.maximum(t, 1e-4)
    mask_low = jnp.where(xs <= t, 1.0, 0.0) * y_
    mask_high = jnp.where(xs > t, 1.0, 0.0) * y_
    h_low = (-(xs * xs) / (t * t) + 2.0 * xs / t) * mask_low
    alpha = 1.0 / jnp.maximum((1.0 - t) * (1.0 - t), EPS)
    h_high = alpha * (1.0 - xs) * (1.0 - 2.0 * t + xs) * mask_high
    if iter % 100 < 80:
        neg = -(1.0 - y_) * jnp.log(jnp.maximum(1.0 - xs, EPS))
        return jnp.mean(h_low + h_high + neg)
    return jnp.sum(h_low) / jnp.sum(mask_low) + jnp.sum(h_high) / jnp.sum(mask_high)


if __name__ == "__main__":
    key = jax.random.PRNGKey(0)
    kx, ky, kfg, ktp = jax.random.split(key, 4)

    b, c, h, w = 2, 4, 16, 16
    x = jax.random.normal(kx, (b, c, h, w), dtype=jnp.float32)
    y = (jax.random.uniform(ky, (b, c)) > 0.5).astype(jnp.float32)
    fg = jax.random.uniform(kfg, (b, c), minval=0.05, maxval=0.5)
    threshold_p = jax.random.normal(ktp, (b, c, h, w), dtype=jnp.float32)

    # Branch A (iter % 100 < 80): top-k threshold, mean piecewise loss.
    loss_a = spatial_bce_loss(x, y, threshold_p=None, fg=fg, iter=0)
    # Branch B (iter % 100 >= 80): threshold from threshold_p, ratio loss.
    loss_b = spatial_bce_loss(x, y, threshold_p=threshold_p, fg=fg, iter=85)
    jax.block_until_ready((loss_a, loss_b))

    ref_a = _reference(x, y, fg=fg, iter=0)
    ref_b = _reference(x, y, threshold_p=threshold_p, iter=85)
    assert jnp.allclose(loss_a, ref_a, rtol=2e-3, atol=1e-5, equal_nan=True), (loss_a, ref_a)
    assert jnp.allclose(loss_b, ref_b, rtol=2e-3, atol=1e-5, equal_nan=True), (loss_b, ref_b)

    print("KERNEL_OK")
</pallas_src>

<mosaic_0001>
module attributes {stable_mosaic.version = 11 : i64} {
  func.func @kernel(%arg0: i32, %arg1: i32, %arg2: memref<8x8xf32, #tpu.memory_space<vmem>>, %arg3: memref<8x256xf32, #tpu.memory_space<vmem>>, %arg4: memref<8x128xf32, #tpu.memory_space<vmem>>) attributes {dimension_semantics = [#tpu.dimension_semantics<parallel>, #tpu.dimension_semantics<arbitrary>], iteration_bounds = array<i64: 1, 1>, scalar_prefetch = 0 : i64, scratch_operands = 0 : i64, tpu.core_type = #tpu.core_type<tc>, window_params = [{transform_indices = @transform_0, window_bounds = array<i64: 8, 8>}, {transform_indices = @transform_1, window_bounds = array<i64: 8, 256>}, {transform_indices = @transform_2, window_bounds = array<i64: 8, 128>}]} {
    %c0_i32 = arith.constant 0 : i32
    %0 = arith.cmpi eq, %arg1, %c0_i32 : i32
    %1 = arith.extui %0 : i1 to i32
    %c0_i32_0 = arith.constant 0 : i32
    %2 = arith.cmpi ne, %1, %c0_i32_0 : i32
    scf.if %2 {
      %cst_14 = arith.constant 0.000000e+00 : f32
      %51 = vector.broadcast %cst_14 : f32 to vector<8x128xf32>
      %c0_15 = arith.constant 0 : index
      %c0_16 = arith.constant 0 : index
      %52 = vector.load %arg4[%c0_15, %c0_16] : memref<8x128xf32, #tpu.memory_space<vmem>>, vector<8x128xf32>
      tpu.vector_store %arg4[%c0_15, %c0_16], %51 {strides = array<i32>} : memref<8x128xf32, #tpu.memory_space<vmem>>, vector<8x128xf32>,
    } else {
    }
    %c0 = arith.constant 0 : index
    %c0_1 = arith.constant 0 : index
    %3 = vector.load %arg2[%c0, %c0_1] : memref<8x8xf32, #tpu.memory_space<vmem>>, vector<8x8xf32>
    %4 = vector.extract_strided_slice %3 {offsets = [0, 0], sizes = [8, 1], strides = [1, 1]} : vector<8x8xf32> to vector<8x1xf32>
    %5 = vector.extract_strided_slice %3 {offsets = [0, 1], sizes = [8, 1], strides = [1, 1]} : vector<8x8xf32> to vector<8x1xf32>
    %6 = vector.extract_strided_slice %3 {offsets = [0, 2], sizes = [8, 1], strides = [1, 1]} : vector<8x8xf32> to vector<8x1xf32>
    %7 = vector.extract_strided_slice %3 {offsets = [0, 3], sizes = [8, 1], strides = [1, 1]} : vector<8x8xf32> to vector<8x1xf32>
    %8 = vector.extract_strided_slice %3 {offsets = [0, 4], sizes = [8, 1], strides = [1, 1]} : vector<8x8xf32> to vector<8x1xf32>
    %9 = vector.extract_strided_slice %3 {offsets = [0, 5], sizes = [8, 1], strides = [1, 1]} : vector<8x8xf32> to vector<8x1xf32>
    %c0_2 = arith.constant 0 : index
    %c0_3 = arith.constant 0 : index
    %10 = vector.load %arg3[%c0_2, %c0_3] : memref<8x256xf32, #tpu.memory_space<vmem>>, vector<8x256xf32>
    %cst = arith.constant 5.000000e-01 : f32
    %11 = vector.broadcast %cst : f32 to vector<8x256xf32>
    %12 = arith.mulf %11, %10 : vector<8x256xf32>
    %13 = math.tanh %12 : vector<8x256xf32>
    %cst_4 = arith.constant 5.000000e-01 : f32
    %14 = vector.broadcast %cst_4 : f32 to vector<8x256xf32>
    %15 = arith.mulf %14, %13 : vector<8x256xf32>
    %cst_5 = arith.constant 5.000000e-01 : f32
    %16 = vector.broadcast %cst_5 : f32 to vector<8x256xf32>
    %17 = arith.addf %15, %16 : vector<8x256xf32>
    %18 = vector.broadcast %7 : vector<8x1xf32> to vector<8x256xf32>
    %19 = arith.mulf %17, %18 : vector<8x256xf32>
    %20 = vector.broadcast %6 : vector<8x1xf32> to vector<8x256xf32>
    %21 = arith.subf %20, %19 : vector<8x256xf32>
    %22 = arith.mulf %17, %21 : vector<8x256xf32>
    %cst_6 = arith.constant 1.000000e+00 : f32
    %23 = vector.broadcast %cst_6 : f32 to vector<8x256xf32>
    %24 = arith.subf %23, %17 : vector<8x256xf32>
    %25 = vector.broadcast %8 : vector<8x1xf32> to vector<8x256xf32>
    %26 = arith.mulf %25, %24 : vector<8x256xf32>
    %27 = vector.broadcast %9 : vector<8x1xf32> to vector<8x256xf32>
    %28 = arith.addf %27, %17 : vector<8x256xf32>
    %29 = arith.mulf %26, %28 : vector<8x256xf32>
    %30 = vector.broadcast %5 : vector<8x1xf32> to vector<8x256xf32>
    %31 = arith.cmpf ole, %17, %30 : vector<8x256xf32>
    %32 = arith.select %31, %22, %29 : vector<8x256xi1>, vector<8x256xf32>
    %33 = vector.broadcast %4 : vector<8x1xf32> to vector<8x256xf32>
    %34 = arith.mulf %33, %32 : vector<8x256xf32>
    %cst_7 = arith.constant 1.000000e+00 : f32
    %35 = vector.broadcast %cst_7 : f32 to vector<8x1xf32>
    %36 = arith.subf %4, %35 : vector<8x1xf32>
    %cst_8 = arith.constant 1.000000e+00 : f32
    %37 = vector.broadcast %cst_8 : f32 to vector<8x256xf32>
    %38 = arith.subf %37, %17 : vector<8x256xf32>
    %cst_9 = arith.constant 9.99999993E-9 : f32
    %39 = vector.broadcast %cst_9 : f32 to vector<8x256xf32>
    %40 = arith.maximumf %38, %39 : vector<8x256xf32>
    %41 = math.log %40 : vector<8x256xf32>
    %42 = vector.broadcast %36 : vector<8x1xf32> to vector<8x256xf32>
    %43 = arith.mulf %42, %41 : vector<8x256xf32>
    %44 = arith.addf %34, %43 : vector<8x256xf32>
    %c0_10 = arith.constant 0 : index
    %c0_11 = arith.constant 0 : index
    %45 = vector.load %arg4[%c0_10, %c0_11] : memref<8x128xf32, #tpu.memory_space<vmem>>, vector<8x128xf32>
    %46 = vector.extract_strided_slice %44 {offsets = [0, 0], sizes = [8, 128], strides = [1, 1]} : vector<8x256xf32> to vector<8x128xf32>
    %47 = arith.addf %45, %46 : vector<8x128xf32>
    %48 = vector.extract_strided_slice %44 {offsets = [0, 128], sizes = [8, 128], strides = [1, 1]} : vector<8x256xf32> to vector<8x128xf32>
    %49 = arith.addf %47, %48 : vector<8x128xf32>
    %c0_12 = arith.constant 0 : index
    %c0_13 = arith.constant 0 : index
    %50 = vector.load %arg4[%c0_12, %c0_13] : memref<8x128xf32, #tpu.memory_space<vmem>>, vector<8x128xf32>
    tpu.vector_store %arg4[%c0_12, %c0_13], %49 {strides = array<i32>} : memref<8x128xf32, #tpu.memory_space<vmem>>, vector<8x128xf32>,
    return
  }
  func.func @transform_0(%arg0: i32, %arg1: i32) -> (i32, i32) {
    %c0_i32 = arith.constant 0 : i32
    %c0_i32_0 = arith.constant 0 : i32
    return %arg0, %c0_i32 : i32, i32
  }
  func.func @transform_1(%arg0: i32, %arg1: i32) -> (i32, i32) {
    %c0_i32 = arith.constant 0 : i32
    return %arg0, %arg1 : i32, i32
  }
  func.func @transform_2(%arg0: i32, %arg1: i32) -> (i32, i32) {
    %c0_i32 = arith.constant 0 : i32
    %c0_i32_0 = arith.constant 0 : i32
    return %arg0, %c0_i32 : i32, i32
  }
}

</mosaic_0001>

<bundles_post_ra>
// kernel: tpu_custom_call.1
= control target key start
LH: loop header
LB: loop body
LE: loop exit
PB: predicated region body
PF: predicated region fallthrough
CT: control target
= control target key end

     0   :  { %7 = vsyncpa [#allocation3], 0  ;;  %s277_s0 = inlined_call_operand.hbm [shape: f32[8,8], index: 0, kind: input, shape index: {}]   ;;  %s278_s1 = inlined_call_operand.hbm [shape: f32[8,256], index: 1, kind: input, shape index: {}]   ;;  %s279_s2 = inlined_call_operand.hbm [shape: f32[8,128], index: 2, kind: output, shape index: {}]  }
   0x1   :  { %8 = vsyncpa [#allocation6], 0 }
   0x2   :  { %9 = vsyncpa [#allocation4], 0  ;;  %s15_s11 = sshll.u32 %s277_s0, 4  ;;  %s244_s12 = smov [#allocation2]   ;;  %s16_s11 = int_to_ptr.hbm [resolvable:$true] %s15_s11 }
   0x3   :  { %s17_s13 = sshll.u32 %s244_s12, 4  ;;  %s26_s16 = sshll.u32 %s278_s1, 4  ;;  %s18_s13 = int_to_ptr.vmem [resolvable:$true] %s17_s13  ;;  %s27_s16 = int_to_ptr.hbm [resolvable:$true] %s26_s16 }
   0x4   :  { %20 = dma.hbm_to_vmem [thread:$0]  %s16_s11, 128, %s18_s13, [#allocation3]  }
   0x5   :  { %s245_s17 = smov [#allocation5]  }
   0x6   :  { %s28_s18 = sshll.u32 %s245_s17, 4  ;;  %s29_s18 = int_to_ptr.vmem [resolvable:$true] %s28_s18 }
   0x7   :  { %31 = dma.hbm_to_vmem [thread:$0]  %s27_s16, 256, %s29_s18, [#allocation6]  }
   0x8   :  { %238 = dma.done.wait [#allocation3], 128  }
   0x9   :  { %239 = vsyncadd [#allocation3], 4294967168 }
   0xa   :  { %240 = dma.done.wait [#allocation6], 256  }
   0xb   :  { %241 = vsyncadd [#allocation6], 4294967040  ;;  %v246_v0 = vmov 4   ;;  %v247_v1 = vmov 3   ;;  %v248_v2 = vmov 1   ;;  %v45_v3 = vld [vmem:[#allocation2] sm:$0xff] }
   0xc   :  { %152 = vset.pattern.permute.xlu1 %v246_v0  ;;  %150 = vset.pattern.permute.xlu0 %v247_v1  ;;  %v249_v4 = vmov 5   ;;  %v250_v5 = vmov 2   ;;  %v251_v6 = vmov 0   ;;  %v139_v7 = vadd.f32 -1.0, %v45_v3  ;;  %v46_v8 = vld [vmem:[#allocation5] sm:$0xff]  ;;  %v47_v9 = vld [vmem:[#allocation5 + $0x8] sm:$0xff] }
   0xd   :  { %154 = vset.pattern.permute.xlu2 %v248_v2  ;;  %74 = vperm.xlu1 %152, %v45_v3   ;;  %v48_v10 = vmul.f32 0.5, %v46_v8  ;;  %v49_v11 = vmul.f32 0.5, %v47_v9  ;;  %s252_s0 = smov [#allocation7]   ;;  %s128_s21 = sshll.u32 %s279_s2, 4  ;;  %s129_s21 = int_to_ptr.hbm [resolvable:$true] %s128_s21 }
   0xe   :  { %58 = vperm.xlu0 %150, %v45_v3   ;;  %88 = vperm.xlu2 %154, %v45_v3   ;;  %s126_s1 = sshll.u32 %s252_s0, 4  ;;  %s127_s1 = int_to_ptr.vmem [resolvable:$true] %s126_s1 }
   0xf   :  { %158 = vtanh.f32 %v48_v10 }
  0x10   :  { %160 = vtanh.f32 %v49_v11 }
  0x15   :  { %153 = vset.pattern.permute.xlu1 %v249_v4  ;;  %v159_v12 = vpop.eup %158 }
  0x16   :  { %151 = vset.pattern.permute.xlu0 %v250_v5  ;;  %80 = vperm.xlu1 %153, %v45_v3   ;;  %v161_v13 = vpop.eup %160  ;;  %v52_v14 = vmul.f32 0.5, %v159_v12 }
  0x17   :  { %64 = vperm.xlu0 %151, %v45_v3   ;;  %155 = vset.pattern.permute.xlu2 %v251_v6  ;;  %v53_v15 = vmul.f32 0.5, %v161_v13 }
  0x18   :  { %96 = vperm.xlu2 %155, %v45_v3   ;;  %v54_v16 = vadd.f32 0.5, %v52_v14 }
  0x19   :  { %v55_v17 = vadd.f32 0.5, %v53_v15 }
  0x1a   :  { %v71_v18 = vsub.f32 1.0, %v54_v16 }
  0x1b   :  { %v72_v19 = vsub.f32 1.0, %v55_v17 }
  0x1c   :  { %v102_v22 = vmax.f32 %v71_v18, 1e-08 }
  0x1d   :  { %v103_v23 = vmax.f32 %v72_v19, 1e-08 }
  0x1e   :  { %156 = vset.pattern.permute.xlu1 %v251_v6  ;;  %162 = vlog2.f32 %v102_v22 }
  0x1f   :  { %157 = vset.pattern.permute.xlu0 %v251_v6  ;;  %110 = vperm.xlu1 %156, %v139_v7   ;;  %164 = vlog2.f32 %v103_v23 }
  0x24   :  { %v163_v34 = vpop.eup %162 }
  0x25   :  { %v165_v35 = vpop.eup %164  ;;  %v105_v41 = vmul.f32 0.6931472, %v163_v34 }
  0x26   :  { %v107_v42 = vmul.f32 0.6931472, %v165_v35 }
  0x68   :  { %v89_v24 = vpop.permute.xlu2 %88 }
  0x69   :  { %vm91_vm0 = vcmp.le.f32.partialorder %v54_v16, %v89_v24  ;;  %vm92_vm1 = vcmp.le.f32.partialorder %v55_v17, %v89_v24 }
  0x72   :  { %v97_v43 = vpop.permute.xlu2 %96 }
  0x7f   :  { %v75_v20 = vpop.permute.xlu1 %74 }
  0x80   :  { %v59_v21 = vpop.permute.xlu0 %58  ;;  %v77_v27 = vmul.f32 %v75_v20, %v71_v18  ;;  %v78_v36 = vmul.f32 %v75_v20, %v72_v19 }
  0x81   :  { %v61_v25 = vmul.f32 %v59_v21, %v54_v16  ;;  %v62_v26 = vmul.f32 %v59_v21, %v55_v17 }
  0x88   :  { %v81_v28 = vpop.permute.xlu1 %80 }
  0x89   :  { %v65_v29 = vpop.permute.xlu0 %64  ;;  %v83_v30 = vadd.f32 %v81_v28, %v54_v16  ;;  %v84_v31 = vadd.f32 %v81_v28, %v55_v17 }
  0x8a   :  { %v67_v32 = vsub.f32 %v65_v29, %v61_v25  ;;  %v68_v33 = vsub.f32 %v65_v29, %v62_v26 }
  0x8b   :  { %v85_v37 = vmul.f32 %v83_v30, %v77_v27  ;;  %v86_v39 = vmul.f32 %v84_v31, %v78_v36 }
  0x8c   :  { %v69_v38 = vmul.f32 %v67_v32, %v54_v16  ;;  %v70_v40 = vmul.f32 %v68_v33, %v55_v17 }
  0x8e   :  { %v93_v44 = vsel %vm91_vm0, %v69_v38, %v85_v37  ;;  %v94_v45 = vsel %vm92_vm1, %v70_v40, %v86_v39 }
  0x8f   :  { %v99_v47 = vmul.f32 %v97_v43, %v93_v44  ;;  %v100_v50 = vmul.f32 %v97_v43, %v94_v45 }
  0x91   :  { %v111_v46 = vpop.permute.xlu1 %110 }
  0x92   :  { %v113_v48 = vmul.f32 %v111_v46, %v105_v41  ;;  %v114_v49 = vmul.f32 %v111_v46, %v107_v42 }
  0x94   :  { %v115_v51 = vadd.f32 %v113_v48, %v99_v47  ;;  %v116_v52 = vadd.f32 %v114_v49, %v100_v50 }
  0x96   :  { %v119_v53 = vadd.f32 %v116_v52, %v115_v51 }
  0x98   :  { %120 = vst [vmem:[#allocation7] sm:$0xff] %v119_v53 }
  0x99   :  { %131 = dma.vmem_to_hbm [thread:$0]  %s127_s1, 128, %s129_s21, [#allocation4]  }
  0x9a   :  { %242 = dma.done.wait [#allocation4], 128  }
  0x9b   :  { %243 = vsyncadd [#allocation4], 4294967168 }
  0x9c   :  { %136 = vsyncpa [#allocation3], 1 }
  0x9d   :  { %137 = vsyncpa [#allocation6], 1 }
  0x9e   :  { %138 = vsyncpa [#allocation4], 1 }

</bundles_post_ra>
